<compile_context>
chip_gen: v5e
topology: v5e:2x2
jax: 0.10.0
libtpu: 0.0.40
codegen_flags: <defaults>
</compile_context>

<pallas_src>
import math
from functools import partial

import jax
import jax.numpy as jnp
from jax.experimental import pallas as pl
from jax.experimental.pallas import tpu as pltpu

_LANES = 128
_CHUNK_BYTES_TARGET = 16 * 1024 * 1024   # per-DMA-descriptor size target
_MAX_CHUNKS = 32                          # cap on statically-unrolled descriptors


def _resolve_shape(in_shape, target_shape):
    """Host-side torch.reshape-style target-shape resolution (handles one -1)."""
    total = math.prod(in_shape)
    tgt = tuple(int(d) for d in target_shape)
    if tgt.count(-1) > 1:
        raise ValueError("only one dimension can be -1 in reshape")
    if -1 in tgt:
        known = math.prod(d for d in tgt if d != -1)
        if known == 0 or total % known != 0:
            raise ValueError(f"cannot reshape array of size {total} into {target_shape}")
        tgt = tuple(total // known if d == -1 else d for d in tgt)
    if math.prod(tgt) != total:
        raise ValueError(f"cannot reshape array of size {total} into shape {tgt}")
    return tgt


def _make_dma_copy_kernel(chunks):
    """Build an HBM->HBM DMA copy kernel.

    `chunks` is a tuple of static (row_start, n_rows) pairs over the leading
    dim of the (rows, W) view; an empty tuple means one whole-ref DMA.
    Up to two DMA descriptors are kept in flight (double-buffered semaphores).
    """

    def kernel(x_hbm, o_hbm, sem):
        if not chunks:
            cp = pltpu.make_async_copy(x_hbm, o_hbm, sem.at[0])
            cp.start()
            cp.wait()
            return
        issued = []
        for idx, (r0, nr) in enumerate(chunks):
            slot = idx % 2
            cp = pltpu.make_async_copy(
                x_hbm.at[pl.ds(r0, nr), :],
                o_hbm.at[pl.ds(r0, nr), :],
                sem.at[slot],
            )
            if idx >= 2:
                issued[idx - 2].wait()   # free this semaphore slot before reuse
            cp.start()
            issued.append(cp)
        for cp in issued[max(0, len(issued) - 2):]:
            cp.wait()

    return kernel


@partial(jax.jit, static_argnums=(1,))
def _reshape_via_dma_copy(x, tgt):
    total = x.size
    if total == 0:
        return jnp.reshape(x, tgt)

    itemsize = jnp.dtype(x.dtype).itemsize
    flat = jnp.reshape(x, (-1,))          # metadata only (contiguous input)

    # Lane-dense 2-D view (rows, W) when the element count allows it; this is
    # what lets us chunk the DMA on aligned row boundaries.  Otherwise the
    # whole flat 1-D buffer is copied by a single DMA (no pad / slice passes).
    W = None
    for cand in (1024, 512, 256, _LANES):
        if total % cand == 0:
            W = cand
            break

    if W is None:
        view = flat                       # ragged total: one whole-ref DMA
        view_shape = (total,)
        chunks = ()
    else:
        rows = total // W
        view_shape = (rows, W)
        view = jnp.reshape(flat, view_shape)

        # Static chunking: ~16 MiB per DMA descriptor, at most _MAX_CHUNKS,
        # chunk starts aligned to the packed-sublane multiple of the dtype
        # (8 rows for f32, 16 for bf16, 32 for int8/fp8).
        row_align = 8 * max(1, 4 // max(1, itemsize))
        row_bytes = W * itemsize
        chunk_bytes = max(_CHUNK_BYTES_TARGET,
                          (total * itemsize + _MAX_CHUNKS - 1) // _MAX_CHUNKS)
        chunk_rows = max(row_align, (chunk_bytes // row_bytes) // row_align * row_align)
        if rows <= chunk_rows:
            chunks = ()                   # whole array in one descriptor
        else:
            bounds = []
            r = 0
            while r < rows:
                nr = min(chunk_rows, rows - r)
                bounds.append((r, nr))
                r += nr
            chunks = tuple(bounds)

    out_view = pl.pallas_call(
        _make_dma_copy_kernel(chunks),
        out_shape=jax.ShapeDtypeStruct(view_shape, x.dtype),
        in_specs=[pl.BlockSpec(memory_space=pl.ANY)],    # raw HBM ref, no auto-DMA
        out_specs=pl.BlockSpec(memory_space=pl.ANY),     # fresh HBM output buffer
        scratch_shapes=[pltpu.SemaphoreType.DMA((2,))],
        cost_estimate=pl.CostEstimate(
            flops=0, transcendentals=0, bytes_accessed=2 * total * itemsize),
    )(view)

    return jnp.reshape(out_view, tgt)


def pallas_reshape(x: jax.Array, target_shape) -> jax.Array:
    """Equivalent of torch.Tensor.reshape(target_shape).

    Shape handling is host-side metadata; the data path (a fresh-output copy)
    runs as a direct HBM->HBM DMA inside a Pallas TPU kernel.
    """
    tgt = _resolve_shape(x.shape, tuple(target_shape))
    return _reshape_via_dma_copy(x, tgt)


class Reshape:
    """Mirror of the PyTorch module: Reshape(*shape)(x) == x.reshape(shape)."""

    def __init__(self, *args):
        self.shape = args

    def __call__(self, x):
        return pallas_reshape(x, self.shape)


if __name__ == "__main__":
    key = jax.random.PRNGKey(0)
    # Small NCHW-style input consistent with the CNN autoencoder flatten step.
    x = jax.random.normal(key, (2, 4, 16, 16), dtype=jnp.float32)

    # Typical use in the autoencoder: flatten channel/spatial dims per batch.
    module = Reshape(2, 4 * 16 * 16)
    y = jax.block_until_ready(module(x))
    ref = x.reshape(2, 4 * 16 * 16)
    assert y.shape == ref.shape, (y.shape, ref.shape)
    assert y.dtype == ref.dtype
    assert bool(jnp.all(y == ref))

    # Also exercise a -1 dim, like Reshape(-1, 256).
    y2 = jax.block_until_ready(Reshape(-1, 256)(x))
    assert y2.shape == (8, 256)
    assert bool(jnp.all(y2 == x.reshape(-1, 256)))

    # Ragged size (not a multiple of 128) exercises the single 1-D DMA path.
    x3 = jax.random.normal(key, (3, 5, 7), dtype=jnp.float32)
    y3 = jax.block_until_ready(Reshape(105)(x3))
    assert y3.shape == (105,)
    assert bool(jnp.all(y3 == x3.reshape(105)))

    print("KERNEL_OK")
</pallas_src>

<mosaic_0001>
module attributes {stable_mosaic.version = 11 : i64} {
  func.func @kernel(%arg0: memref<2x1024xf32, #tpu.memory_space<any>>, %arg1: memref<2x1024xf32, #tpu.memory_space<any>>, %arg2: memref<2x!tpu.dma_semaphore, #tpu.memory_space<semaphore_mem>>) attributes {dimension_semantics = [], scalar_prefetch = 0 : i64, scratch_operands = 1 : i64, tpu.core_type = #tpu.core_type<tc>} {
    %c0_i32 = arith.constant 0 : i32
    %0 = tpu.memref_slice %arg2[%c0_i32] : memref<2x!tpu.dma_semaphore, #tpu.memory_space<semaphore_mem>> -> memref<1x!tpu.dma_semaphore, #tpu.memory_space<semaphore_mem>>
    %1 = tpu.memref_squeeze %0 : memref<1x!tpu.dma_semaphore, #tpu.memory_space<semaphore_mem>> -> memref<!tpu.dma_semaphore, #tpu.memory_space<semaphore_mem>>
    tpu.enqueue_dma source(%arg0 : memref<2x1024xf32, #tpu.memory_space<any>>) target(%arg1 : memref<2x1024xf32, #tpu.memory_space<any>>) target_semaphore(%1 : memref<!tpu.dma_semaphore, #tpu.memory_space<semaphore_mem>>)
    %c0_i32_0 = arith.constant 0 : i32
    %2 = tpu.memref_slice %arg2[%c0_i32_0] : memref<2x!tpu.dma_semaphore, #tpu.memory_space<semaphore_mem>> -> memref<1x!tpu.dma_semaphore, #tpu.memory_space<semaphore_mem>>
    %3 = tpu.memref_squeeze %2 : memref<1x!tpu.dma_semaphore, #tpu.memory_space<semaphore_mem>> -> memref<!tpu.dma_semaphore, #tpu.memory_space<semaphore_mem>>
    tpu.wait_dma2 semaphore(%3 : memref<!tpu.dma_semaphore, #tpu.memory_space<semaphore_mem>>) src(%arg0 : memref<2x1024xf32, #tpu.memory_space<any>>) dst(%arg1 : memref<2x1024xf32, #tpu.memory_space<any>>)
    return
  }
}

</mosaic_0001>

<bundles_post_ra>
// kernel: _reshape_via_dma_copy.1
= control target key start
LH: loop header
LB: loop body
LE: loop exit
PB: predicated region body
PF: predicated region fallthrough
CT: control target
= control target key end

     0   :  { %s80_s0 = inlined_call_operand.vmem [shape: f32[2,1024], index: 0, kind: input, shape index: {}]   ;;  %s81_s1 = inlined_call_operand.hbm [shape: f32[2,1024], index: 1, kind: output, shape index: {}]  }
   0x1   :  { %s13_s8 = sshll.u32 %s80_s0, 4  ;;  %s15_s11 = sshll.u32 %s81_s1, 4  ;;  %s14_s8 = int_to_ptr.vmem [resolvable:$true] %s13_s8  ;;  %s16_s11 = int_to_ptr.hbm [resolvable:$true] %s15_s11 }
   0x2   :  { %18 = dma.vmem_to_hbm [thread:$0]  %s14_s8, 256, %s16_s11, [#allocation2] }
   0x3   :  { %62 = dma.done.wait [#allocation2], 256 }
   0x4   :  { %63 = vsyncadd [#allocation2], 4294967040 }
   0x5   :  { %23 = vsyncmov [#allocation2] }
   0x8   :  { %s24_s12 = vpop.sfrf %23 }
   0x9   :  { %p36_p0 = scmp.ne.s32.totalorder %s24_s12, 0 }
   0xb   :  { %28 = shalt.err (%p36_p0)  }
   0xc   :  { %30 = vsyncmov [#allocation2 + $0x1] }
   0xf   :  { %s31_s13 = vpop.sfrf %30 }
  0x10   :  { %p37_p1 = scmp.ne.s32.totalorder %s31_s13, 0 }
  0x12   :  { %35 = shalt.err (%p37_p1)  }

</bundles_post_ra>
